<compile_context>
chip_gen: v7x
topology: tpu7x:2x2x1
jax: 0.10.0
libtpu: 0.0.40
codegen_flags: <defaults>
</compile_context>

<pallas_src>
import functools

import jax
import jax.numpy as jnp
from jax import lax
from jax.experimental import pallas as pl
from jax.experimental.pallas import tpu as pltpu


# ----------------------------------------------------------------------------
# Helpers.
# ----------------------------------------------------------------------------
def _cdiv(a, b):
    return -(-a // b)


def _round_up(v, m):
    return _cdiv(v, m) * m


def _pad_last(arr, new_size):
    pad = new_size - arr.shape[-1]
    if pad == 0:
        return arr
    widths = [(0, 0)] * (arr.ndim - 1) + [(0, pad)]
    return jnp.pad(arr, widths)


# ----------------------------------------------------------------------------
# Single-block kernel (small / mid N: launch-overhead bound, no tiling).
# ----------------------------------------------------------------------------
def _single_block_kernel(x_ref, a_ref, b_ref, gmean_ref, obj_ref, grad_ref):
    x = x_ref[...]              # (1, N)
    A = a_ref[...]              # (N, N), symmetric (precondition)
    b = b_ref[...]              # (1, N)
    gmean = gmean_ref[...]      # (1, N)  pre-reduced grad-noise mean

    # A @ x  (A symmetric => x @ A == (A @ x)^T), on the MXU.
    ax = jnp.dot(x, A, preferred_element_type=jnp.float32)          # (1, N)

    # f(x) = 0.5 * x^T A x - b^T x
    obj_true = 0.5 * jnp.sum(ax * x) - jnp.sum(b * x)
    obj_ref[...] = jnp.full((1, 1), obj_true, jnp.float32)
    grad_ref[...] = (ax - b + gmean).astype(grad_ref.dtype)


# ----------------------------------------------------------------------------
# Tiled kernel (large N): grid = (num_j, num_k).
#   j (parallel, first): column stripe of A / output stripe of grad.
#   k (arbitrary, last): contraction tiles; the grad output block is the
#   resident f32 accumulator across k.
# A is streamed UNPADDED; boundary tiles (ragged tail) are masked in-kernel.
# ----------------------------------------------------------------------------
def _tiled_kernel(xk_ref, xj_ref, a_ref, b_ref, gmean_ref,
                  grad_ref, objrow_ref,
                  *, n, tile_k, tile_n, mask_rows, mask_cols):
    j = pl.program_id(0)
    k = pl.program_id(1)
    nk = pl.num_programs(1)

    @pl.when(k == 0)
    def _init():
        grad_ref[...] = jnp.zeros_like(grad_ref)
        objrow_ref[...] = jnp.zeros_like(objrow_ref)

    a = a_ref[...]                                      # (TK, TN)
    if mask_rows:
        # Ragged contraction tail of A: zero garbage rows (>= n) before the
        # MXU dot so they cannot poison valid lanes of the accumulator.
        rows = k * tile_k + lax.broadcasted_iota(jnp.int32, a.shape, 0)
        a = jnp.where(rows < n, a, 0.0)

    # Partial stripe of A @ x:  (1, TK) @ (TK, TN) -> (1, TN), accumulated
    # directly into the resident f32 output block.
    grad_ref[...] += jnp.dot(xk_ref[...], a, preferred_element_type=jnp.float32)

    @pl.when(k == nk - 1)
    def _finalize():
        ax = grad_ref[...]                   # full (A x) for this stripe
        xj = xj_ref[...]                     # (1, TN) stripe of x (zero-padded)
        bj = b_ref[...]                      # (1, TN) stripe of b (zero-padded)

        # Per-stripe objective contribution: sum_j (0.5*(Ax)_j - b_j) * x_j
        prod = (0.5 * ax - bj) * xj
        if mask_cols:
            # Ragged output tail of A: columns >= n carry garbage; mask the
            # products (xj is 0 there but 0 * NaN would still be NaN).
            cols = j * tile_n + lax.broadcasted_iota(jnp.int32, prod.shape, 1)
            prod = jnp.where(cols < n, prod, 0.0)
        obj_partial = jnp.sum(prod)

        # Lane-dense partial-objective row: lane 0 of the stripe carries the
        # partial, remaining lanes are exact zeros (summed in the wrapper).
        lane = lax.broadcasted_iota(jnp.int32, objrow_ref.shape, 1)
        objrow_ref[...] = jnp.where(lane == 0, obj_partial,
                                    0.0).astype(jnp.float32)

        # grad = A x - b + mean(grad_noise)   (pre-reduced mean stripe).
        grad_ref[...] = ax - bj + gmean_ref[...]


# ----------------------------------------------------------------------------
# Wrapper.
# ----------------------------------------------------------------------------
def cutest_additive_noise_forward(x, A, b, obj_noise, grad_noise, *,
                                  tile_k=2048, tile_n=1024, min_tiled_n=1536):
    """Noisy objective / gradient of the synthetic CUTEst quadratic.

    Returns (obj (1, 1), grad (1, N)).  A must be symmetric (precondition of
    the x @ A formulation of the gradient).
    """
    x = jnp.asarray(x, jnp.float32).reshape(1, -1)
    n = x.shape[1]
    A = jnp.asarray(A, jnp.float32)
    b = jnp.asarray(b, jnp.float32).reshape(1, n)

    # Additive-noise averaging hoisted to cheap XLA reduces: the kernel is
    # HBM-bound on A, so pre-reducing the (S, N) noise shrinks kernel DMA and
    # removes the per-stripe reduction from the epilogue.
    onoise_mean = jnp.mean(jnp.asarray(obj_noise, jnp.float32))
    gmean = jnp.mean(jnp.asarray(grad_noise, jnp.float32).reshape(-1, n),
                     axis=0, keepdims=True)                         # (1, N)

    # ---------------- small/mid-problem path: single VMEM-resident block ----
    if n < min_tiled_n:
        need = 4 * (n * n + 4 * n + 1)
        vmem_limit = int(min(max(2 * need + (8 << 20), 16 << 20), 48 << 20))
        obj, grad = pl.pallas_call(
            _single_block_kernel,
            out_shape=(jax.ShapeDtypeStruct((1, 1), jnp.float32),
                       jax.ShapeDtypeStruct((1, n), jnp.float32)),
            grid=(1,),
            in_specs=[
                pl.BlockSpec((1, n), lambda i: (0, 0)),    # x
                pl.BlockSpec((n, n), lambda i: (0, 0)),    # A
                pl.BlockSpec((1, n), lambda i: (0, 0)),    # b
                pl.BlockSpec((1, n), lambda i: (0, 0)),    # grad-noise mean
            ],
            out_specs=(
                pl.BlockSpec((1, 1), lambda i: (0, 0)),
                pl.BlockSpec((1, n), lambda i: (0, 0)),
            ),
            compiler_params=pltpu.CompilerParams(
                dimension_semantics=("arbitrary",),
                vmem_limit_bytes=vmem_limit),
            cost_estimate=pl.CostEstimate(
                flops=2 * n * n + 6 * n,
                transcendentals=0,
                bytes_accessed=4 * (n * n + 5 * n + 1)),
        )(x, A, b, gmean)
        return obj + onoise_mean, grad

    # ---------------- tiled path: stream A (unpadded) at HBM roofline --------
    # Lane dim of every block stays a multiple of 128; clamp to problem size.
    tile_n = max(128, min(tile_n, _round_up(n, 128)))
    tile_k = max(128, min(tile_k, _round_up(n, 128)))
    # Guarantee >= 2 column stripes so the "parallel" j axis actually feeds
    # both TensorCores on v7x (harmless on single-TC v5e/v6e).
    if n >= 256:
        tile_n = min(tile_n, _round_up((n + 1) // 2, 128))

    num_k = _cdiv(n, tile_k)
    num_j = _cdiv(n, tile_n)
    n_pad_k = num_k * tile_k
    n_pad_j = num_j * tile_n
    n_pad_x = max(n_pad_k, n_pad_j)

    # Only the O(N) vectors get zero-padded (exact for the quadratic); A is
    # left untouched in HBM -- no extra read+write pass over the big array.
    x_p = _pad_last(x, n_pad_x)          # serves both contraction & stripe views
    b_p = _pad_last(b, n_pad_j)
    gmean_p = _pad_last(gmean, n_pad_j)

    mask_rows = (n % tile_k) != 0        # ragged contraction tail of A
    mask_cols = (n % tile_n) != 0        # ragged output-stripe tail of A

    kernel = functools.partial(_tiled_kernel, n=n, tile_k=tile_k,
                               tile_n=tile_n, mask_rows=mask_rows,
                               mask_cols=mask_cols)

    # Explicit scoped-VMEM budget: double-buffered blocks + headroom, clamped
    # so it fits every generation (v5e default 16 MiB; v7x 64 MiB physical).
    need = 4 * (2 * tile_k * tile_n + 2 * tile_k + 10 * tile_n)
    vmem_limit = int(min(max(need + (8 << 20), 32 << 20), 48 << 20))

    grad_p, objrow = pl.pallas_call(
        kernel,
        out_shape=(jax.ShapeDtypeStruct((1, n_pad_j), jnp.float32),
                   jax.ShapeDtypeStruct((1, n_pad_j), jnp.float32)),
        grid=(num_j, num_k),
        in_specs=[
            pl.BlockSpec((1, tile_k), lambda j, k: (0, k)),        # x, contraction view
            pl.BlockSpec((1, tile_n), lambda j, k: (0, j)),        # x, output-stripe view
            pl.BlockSpec((tile_k, tile_n), lambda j, k: (k, j)),   # A tile (unpadded)
            pl.BlockSpec((1, tile_n), lambda j, k: (0, j)),        # b stripe
            pl.BlockSpec((1, tile_n), lambda j, k: (0, j)),        # grad-noise mean stripe
        ],
        out_specs=(
            pl.BlockSpec((1, tile_n), lambda j, k: (0, j)),        # grad (resident acc)
            pl.BlockSpec((1, tile_n), lambda j, k: (0, j)),        # obj partial row
        ),
        compiler_params=pltpu.CompilerParams(
            dimension_semantics=("parallel", "arbitrary"),
            vmem_limit_bytes=vmem_limit),
        cost_estimate=pl.CostEstimate(
            flops=2 * n * n + 6 * n,
            transcendentals=0,
            bytes_accessed=4 * (n * n + 6 * n)),
    )(x_p, x_p, A, b_p, gmean_p)

    obj = jnp.sum(objrow).reshape(1, 1) + onoise_mean   # non-partial lanes are 0.0
    grad = grad_p[:, :n]
    return obj, grad


# ----------------------------------------------------------------------------
# Pure-JAX reference.
# ----------------------------------------------------------------------------
def reference_forward(x, A, b, obj_noise, grad_noise):
    ax = x @ A
    obj_true = 0.5 * jnp.sum(ax * x) - jnp.sum(b * x)
    grad_true = ax - b
    obj = obj_true + jnp.mean(obj_noise)
    grad = grad_true + jnp.mean(grad_noise, axis=0, keepdims=True)
    return obj, grad


def _make_problem(key, n, num_samples):
    k_x, k_m, k_b, k_on, k_gn = jax.random.split(key, 5)
    # "Parameters": the module's self.variables (initialized from problem.x0).
    x = jax.random.normal(k_x, (1, n), dtype=jnp.float32)
    # Deterministic synthetic CUTEst problem data: symmetric PD A, vector b.
    M = jax.random.normal(k_m, (n, n), dtype=jnp.float32) / jnp.sqrt(n)
    A = M.T @ M + jnp.eye(n, dtype=jnp.float32)
    b = jax.random.normal(k_b, (1, n), dtype=jnp.float32)
    # Deterministic pre-drawn noise samples (stand-ins for obj_noise_func /
    # grad_noise_func calls, one per sample).
    obj_noise = 0.01 * jax.random.normal(k_on, (num_samples, 1), jnp.float32)
    grad_noise = 0.01 * jax.random.normal(k_gn, (num_samples, n), jnp.float32)
    return x, A, b, obj_noise, grad_noise


if __name__ == "__main__":
    # TODO(synk): the true pycutest `problem.obj` black-box objective has no
    # tensor definition; a synthetic symmetric quadratic stands in for it here.
    key = jax.random.PRNGKey(0)
    k0, k1, k2 = jax.random.split(key, 3)

    ok = True

    # --- small problem: single-block (launch-overhead-bound) path -----------
    N, S = 128, 8
    x, A, b, on, gn = _make_problem(k0, N, S)
    obj, grad = cutest_additive_noise_forward(x, A, b, on, gn)
    jax.block_until_ready((obj, grad))
    obj_r, grad_r = reference_forward(x, A, b, on, gn)
    ok &= bool(jnp.allclose(obj[0, 0], obj_r, rtol=1e-3, atol=1e-3))
    ok &= bool(jnp.allclose(grad, grad_r, rtol=1e-3, atol=1e-3))

    # --- forced tiled path, tile-aligned N (no ragged masks) ----------------
    N1, S1 = 512, 8
    x1, A1, b1, on1, gn1 = _make_problem(k1, N1, S1)
    obj1, grad1 = cutest_additive_noise_forward(
        x1, A1, b1, on1, gn1, tile_k=256, tile_n=256, min_tiled_n=0)
    jax.block_until_ready((obj1, grad1))
    obj1_r, grad1_r = reference_forward(x1, A1, b1, on1, gn1)
    ok &= bool(jnp.allclose(obj1[0, 0], obj1_r, rtol=2e-3, atol=2e-3))
    ok &= bool(jnp.allclose(grad1, grad1_r, rtol=2e-3, atol=2e-3))

    # --- forced tiled path, ragged N (exercises unpadded-A boundary masks) --
    N2, S2 = 416, 8
    x2, A2, b2, on2, gn2 = _make_problem(k2, N2, S2)
    obj2, grad2 = cutest_additive_noise_forward(
        x2, A2, b2, on2, gn2, tile_k=256, tile_n=256, min_tiled_n=0)
    jax.block_until_ready((obj2, grad2))
    obj2_r, grad2_r = reference_forward(x2, A2, b2, on2, gn2)
    ok &= bool(jnp.allclose(obj2[0, 0], obj2_r, rtol=2e-3, atol=2e-3))
    ok &= bool(jnp.allclose(grad2, grad2_r, rtol=2e-3, atol=2e-3))

    if ok:
        print("KERNEL_OK")
    else:
        print("KERNEL_MISMATCH")
</pallas_src>

<mosaic_0001>
module attributes {stable_mosaic.version = 11 : i64} {
  func.func @_single_block_kernel(%arg0: i32, %arg1: memref<1x128xf32, #tpu.memory_space<vmem>>, %arg2: memref<128x128xf32, #tpu.memory_space<vmem>>, %arg3: memref<1x128xf32, #tpu.memory_space<vmem>>, %arg4: memref<1x128xf32, #tpu.memory_space<vmem>>, %arg5: memref<1x1xf32, #tpu.memory_space<vmem>>, %arg6: memref<1x128xf32, #tpu.memory_space<vmem>>) attributes {dimension_semantics = [#tpu.dimension_semantics<arbitrary>], iteration_bounds = array<i64: 1>, scalar_prefetch = 0 : i64, scratch_operands = 0 : i64, tpu.core_type = #tpu.core_type<tc>, window_params = [{pipeline_mode = #tpu.pipeline_mode<synchronous>, transform_indices = @transform_0, window_bounds = array<i64: 1, 128>}, {pipeline_mode = #tpu.pipeline_mode<synchronous>, transform_indices = @transform_1, window_bounds = array<i64: 128, 128>}, {pipeline_mode = #tpu.pipeline_mode<synchronous>, transform_indices = @transform_2, window_bounds = array<i64: 1, 128>}, {pipeline_mode = #tpu.pipeline_mode<synchronous>, transform_indices = @transform_3, window_bounds = array<i64: 1, 128>}, {pipeline_mode = #tpu.pipeline_mode<synchronous>, transform_indices = @transform_4, window_bounds = array<i64: 1, 1>}, {pipeline_mode = #tpu.pipeline_mode<synchronous>, transform_indices = @transform_5, window_bounds = array<i64: 1, 128>}]} {
    %c0 = arith.constant 0 : index
    %c0_0 = arith.constant 0 : index
    %0 = vector.load %arg1[%c0, %c0_0] : memref<1x128xf32, #tpu.memory_space<vmem>>, vector<1x128xf32>
    %c0_1 = arith.constant 0 : index
    %c0_2 = arith.constant 0 : index
    %1 = vector.load %arg2[%c0_1, %c0_2] : memref<128x128xf32, #tpu.memory_space<vmem>>, vector<128x128xf32>
    %c0_3 = arith.constant 0 : index
    %c0_4 = arith.constant 0 : index
    %2 = vector.load %arg3[%c0_3, %c0_4] : memref<1x128xf32, #tpu.memory_space<vmem>>, vector<1x128xf32>
    %c0_5 = arith.constant 0 : index
    %c0_6 = arith.constant 0 : index
    %3 = vector.load %arg4[%c0_5, %c0_6] : memref<1x128xf32, #tpu.memory_space<vmem>>, vector<1x128xf32>
    %cst = arith.constant dense<0.000000e+00> : vector<1x128xf32>
    %4 = tpu.matmul %0, %1, %cst {dimension_numbers = #tpu.dot_dimension_numbers<[1], [0], [0], [1], [0, 0, 1, 1], [], []>} : vector<1x128xf32>, vector<128x128xf32>, vector<1x128xf32> -> vector<1x128xf32>
    %5 = arith.mulf %4, %0 : vector<1x128xf32>
    %6 = vector.shape_cast %5 : vector<1x128xf32> to vector<1x1x128xf32>
    %cst_7 = arith.constant dense<0.000000e+00> : vector<1xf32>
    %7 = vector.multi_reduction <add>, %6, %cst_7 [1, 2] : vector<1x1x128xf32> to vector<1xf32>
    %8 = vector.shape_cast %7 : vector<1xf32> to vector<1x1x1xf32>
    %9 = vector.extract %8[0, 0, 0] : f32 from vector<1x1x1xf32>
    %cst_8 = arith.constant 5.000000e-01 : f32
    %10 = arith.mulf %cst_8, %9 : f32
    %11 = arith.mulf %2, %0 : vector<1x128xf32>
    %12 = vector.shape_cast %11 : vector<1x128xf32> to vector<1x1x128xf32>
    %cst_9 = arith.constant dense<0.000000e+00> : vector<1xf32>
    %13 = vector.multi_reduction <add>, %12, %cst_9 [1, 2] : vector<1x1x128xf32> to vector<1xf32>
    %14 = vector.shape_cast %13 : vector<1xf32> to vector<1x1x1xf32>
    %15 = vector.extract %14[0, 0, 0] : f32 from vector<1x1x1xf32>
    %16 = arith.subf %10, %15 : f32
    %17 = vector.broadcast %16 : f32 to vector<1x1xf32>
    %c0_10 = arith.constant 0 : index
    %c0_11 = arith.constant 0 : index
    %18 = vector.load %arg5[%c0_10, %c0_11] : memref<1x1xf32, #tpu.memory_space<vmem>>, vector<1x1xf32>
    tpu.vector_store %arg5[%c0_10, %c0_11], %17 {strides = array<i32>} : memref<1x1xf32, #tpu.memory_space<vmem>>, vector<1x1xf32>,
    %19 = arith.subf %4, %2 : vector<1x128xf32>
    %20 = arith.addf %19, %3 : vector<1x128xf32>
    %c0_12 = arith.constant 0 : index
    %c0_13 = arith.constant 0 : index
    %21 = vector.load %arg6[%c0_12, %c0_13] : memref<1x128xf32, #tpu.memory_space<vmem>>, vector<1x128xf32>
    tpu.vector_store %arg6[%c0_12, %c0_13], %20 {strides = array<i32>} : memref<1x128xf32, #tpu.memory_space<vmem>>, vector<1x128xf32>,
    return
  }
  func.func @transform_0(%arg0: i32) -> (i32, i32) {
    %c0_i32 = arith.constant 0 : i32
    %c0_i32_0 = arith.constant 0 : i32
    %c0_i32_1 = arith.constant 0 : i32
    return %c0_i32, %c0_i32_0 : i32, i32
  }
  func.func @transform_1(%arg0: i32) -> (i32, i32) {
    %c0_i32 = arith.constant 0 : i32
    %c0_i32_0 = arith.constant 0 : i32
    %c0_i32_1 = arith.constant 0 : i32
    return %c0_i32, %c0_i32_0 : i32, i32
  }
  func.func @transform_2(%arg0: i32) -> (i32, i32) {
    %c0_i32 = arith.constant 0 : i32
    %c0_i32_0 = arith.constant 0 : i32
    %c0_i32_1 = arith.constant 0 : i32
    return %c0_i32, %c0_i32_0 : i32, i32
  }
  func.func @transform_3(%arg0: i32) -> (i32, i32) {
    %c0_i32 = arith.constant 0 : i32
    %c0_i32_0 = arith.constant 0 : i32
    %c0_i32_1 = arith.constant 0 : i32
    return %c0_i32, %c0_i32_0 : i32, i32
  }
  func.func @transform_4(%arg0: i32) -> (i32, i32) {
    %c0_i32 = arith.constant 0 : i32
    %c0_i32_0 = arith.constant 0 : i32
    %c0_i32_1 = arith.constant 0 : i32
    return %c0_i32, %c0_i32_0 : i32, i32
  }
  func.func @transform_5(%arg0: i32) -> (i32, i32) {
    %c0_i32 = arith.constant 0 : i32
    %c0_i32_0 = arith.constant 0 : i32
    %c0_i32_1 = arith.constant 0 : i32
    return %c0_i32, %c0_i32_0 : i32, i32
  }
}

</mosaic_0001>

<bundles_post_ra>
// kernel: tpu_custom_call.1
= control target key start
LH: loop header
LB: loop body
LE: loop exit
PB: predicated region body
PF: predicated region fallthrough
CT: control target
= control target key end

     0   :  { %11 = vsyncpa [#allocation3], 0  ;;  %s482_s0 = inlined_call_operand.hbm [shape: f32[1,128], index: 0, kind: input, shape index: {}]   ;;  %s483_s1 = inlined_call_operand.hbm [shape: f32[128,128], index: 1, kind: input, shape index: {}]   ;;  %s484_s2 = inlined_call_operand.vmem [shape: f32[1,128], index: 2, kind: input, shape index: {}]   ;;  %s485_s3 = inlined_call_operand.vmem [shape: f32[1,128], index: 3, kind: input, shape index: {}]   ;;  %s486_s4 = inlined_call_operand.hbm [shape: f32[1,1], index: 4, kind: output, shape index: {0}]   ;;  %s487_s5 = inlined_call_operand.hbm [shape: f32[1,128], index: 5, kind: output, shape index: {1}]  }
   0x1   :  { %12 = vsyncpa [#allocation6], 0 }
   0x2   :  { %13 = vsyncpa [#allocation4], 0 }
   0x3   :  { %14 = vsyncpa [#allocation9], 0  ;;  %s382_s18 = smov [#allocation2]   ;;  %s383_s20 = smov [#allocation5]  }
   0x4   :  { %s21_s19 = sshll.u32 %s382_s18, 4  ;;  %s30_s21 = sshll.u32 %s383_s20, 4  ;;  %s22_s19 = int_to_ptr.vmem [resolvable:$true] %s21_s19  ;;  %s421_s21 = int_to_ptr.vmem [resolvable:$true] %s30_s21 }
   0x5   :  { %s286_s24 = scalar_lea.hbm %s482_s0, 16 }
   0x6   :  { %p287_p0 = scmp.ne.s32.totalorder %s482_s0, %s286_s24  ;;  %p290_p1 = scmp.lt.u32.totalorder %s286_s24, %s482_s0 }
   0x8   :  { %p292_p2 = pnand %p290_p1, %p287_p0 }
   0xa   :  { %295 = shalt.err (!%p292_p2)
}
   0xb   :  { %s296_s29 = scalar_lea.vmem %s22_s19, 16  ;;  %s300_s30 = scalar_lea.vmem %s22_s19, 32 }
   0xc   :  { %p297_p3 = scmp.ne.s32.totalorder %s22_s19, %s296_s29  ;;  %p301_p4 = scmp.lt.s32.totalorder %s22_s19, %s22_s19 }
   0xd   :  { %p302_p5 = scmp.lt.s32.totalorder %s300_s30, %s296_s29 }
   0xf   :  { %p303_p6 = por %p302_p5, %p301_p4 }
  0x11   :  { %p304_p7 = pnand %p303_p6, %p297_p3 }
  0x13   :  { %307 = shalt.err (!%p304_p7)
}
  0x14   :  { %24 = dma.hbm_to_vmem [thread:$0]  %s482_s0, 16, %s22_s19, [#allocation3]  }
  0x15   :  { %s308_s10 = scalar_lea.hbm %s483_s1, 2048 }
  0x16   :  { %p309_p8 = scmp.ne.s32.totalorder %s483_s1, %s308_s10  ;;  %p312_p9 = scmp.lt.u32.totalorder %s308_s10, %s483_s1 }
  0x18   :  { %p314_p10 = pnand %p312_p9, %p309_p8 }
  0x1a   :  { %317 = shalt.err (!%p314_p10)
}
  0x1b   :  { %s318_s15 = scalar_lea.vmem %s421_s21, 2048  ;;  %p323_p12 = scmp.lt.s32.totalorder %s421_s21, %s421_s21 }
  0x1c   :  { %p319_p11 = scmp.ne.s32.totalorder %s421_s21, %s318_s15  ;;  %p324_p13 = scmp.lt.s32.totalorder %s318_s15, %s318_s15 }
  0x1e   :  { %p325_p0 = por %p324_p13, %p323_p12 }
  0x20   :  { %p326_p1 = pnand %p325_p0, %p319_p11 }
  0x22   :  { %329 = shalt.err (!%p326_p1)
}
  0x23   :  { %s384_s0 = smov 128   ;;  %s385_s16 = smov 8  }
  0x24   :  { %36 = dma.hbm_to_vmem [thread:$0]  %s483_s1, 2048, %s421_s21, [#allocation6], %s384_s0, %s384_s0, %s385_s16  }
  0x25   :  { %374 = dma.done.wait [#allocation3], 16  }
  0x26   :  { %375 = vsyncadd [#allocation3], 4294967280 }
  0x27   :  { %376 = dma.done.wait [#allocation6], 2048  }
  0x28   :  { %377 = vsyncadd [#allocation6], 4294965248  ;;  %v386_v0 = vmov 0.0|0.0   ;;  %vm387_vm0 = vmmov 0   ;;  %v388_v1 = vmov 0.0   ;;  %v48_v2 = vld [vmem:[#allocation5] sm:$0xff] }
  0x29   :  { %249 = vmatprep.subr.bf16.mxu0 %v386_v0  ;;  %246 = vmatprep.mubr.msk.f32.mxu0 %vm387_vm0, %v388_v1  ;;  %v49_v3 = vld [vmem:[#allocation5 + $0x8] sm:$0xff]  ;;  %v50_v4 = vld [vmem:[#allocation5 + $0x10] sm:$0xff]  ;;  %v51_v6 = vld [vmem:[#allocation5 + $0x18] sm:$0xff]  ;;  %vm137_vm1 = vcmask 1040384   ;;  %s389_s22 = smov [#allocation8]  }
  0x2a   :  { %v250_v5 = vpack.c.bf16 %v49_v3, %v48_v2  ;;  %v253_v7 = vpack.c.bf16 %v51_v6, %v50_v4  ;;  %v52_v8 = vld [vmem:[#allocation5 + $0x20] sm:$0xff]  ;;  %v53_v9 = vld [vmem:[#allocation5 + $0x28] sm:$0xff]  ;;  %v54_v11 = vld [vmem:[#allocation5 + $0x30] sm:$0xff]  ;;  %s183_s23 = sshll.u32 %s389_s22, 4  ;;  %s184_s23 = int_to_ptr.vmem [resolvable:$true] %s183_s23 }
  0x2b   :  { %v256_v10 = vpack.c.bf16 %v53_v9, %v52_v8  ;;  %v55_v12 = vld [vmem:[#allocation5 + $0x38] sm:$0xff]  ;;  %v56_v14 = vld [vmem:[#allocation5 + $0x40] sm:$0xff]  ;;  %v57_v15 = vld [vmem:[#allocation5 + $0x48] sm:$0xff]  ;;  %s334_s24 = scalar_lea.vmem %s184_s23, 32  ;;  %p335_p3 = scmp.lt.s32.totalorder %s184_s23, %s184_s23 }
  0x2c   :  { %251 = vmatpush3.bf16.msra.mxu0 %v250_v5  ;;  %v259_v13 = vpack.c.bf16 %v55_v12, %v54_v11  ;;  %v262_v16 = vpack.c.bf16 %v57_v15, %v56_v14  ;;  %v58_v17 = vld [vmem:[#allocation5 + $0x50] sm:$0xff]  ;;  %v59_v18 = vld [vmem:[#allocation5 + $0x58] sm:$0xff]  ;;  %v60_v20 = vld [vmem:[#allocation5 + $0x60] sm:$0xff] }
  0x2d   :  { %252 = vmatprep.subr.bf16.mxu0 %v386_v0  ;;  %v265_v19 = vpack.c.bf16 %v59_v18, %v58_v17  ;;  %v61_v21 = vld [vmem:[#allocation5 + $0x68] sm:$0xff]  ;;  %v62_v23 = vld [vmem:[#allocation5 + $0x70] sm:$0xff]  ;;  %v63_v24 = vld [vmem:[#allocation5 + $0x78] sm:$0xff] }
  0x2e   :  { %v268_v22 = vpack.c.bf16 %v61_v21, %v60_v20  ;;  %v271_v25 = vpack.c.bf16 %v63_v24, %v62_v23  ;;  %v47_v26 = vld [vmem:[#allocation2] sm:$0x1] }
  0x2f   :  { %v64_v27 = vld [vmem:[%s484_s2] sm:$0x1]  ;;  %s330_s2 = scalar_lea.vmem %s184_s23, 16 }
  0x30   :  { %254 = vmatpush3.bf16.msra.mxu0 %v253_v7  ;;  %v65_v29 = vld [vmem:[%s485_s3] sm:$0x1]  ;;  %v149_v33 = vmul.f32 %v64_v27, %v47_v26  ;;  %p331_p2 = scmp.ne.s32.totalorder %s184_s23, %s330_s2  ;;  %p336_p4 = scmp.lt.s32.totalorder %s334_s24, %s330_s2 }
  0x31   :  { %255 = vmatprep.subr.bf16.mxu0 %v386_v0 }
  0x32   :  { %v150_v36 = vsel %vm137_vm1, %v149_v33, 0.0  ;;  %p337_p5 = por %p336_p4, %p335_p3 }
  0x34   :  { %257 = vmatpush3.bf16.msra.mxu0 %v256_v10  ;;  %p338_p6 = pnand %p337_p5, %p331_p2 }
  0x35   :  { %258 = vmatprep.subr.bf16.mxu0 %v386_v0 }
  0x38   :  { %260 = vmatpush3.bf16.msra.mxu0 %v259_v13 }
  0x39   :  { %261 = vmatprep.subr.bf16.mxu0 %v386_v0 }
  0x3c   :  { %263 = vmatpush3.bf16.msra.mxu0 %v262_v16 }
  0x3d   :  { %264 = vmatprep.subr.bf16.mxu0 %v386_v0 }
  0x40   :  { %266 = vmatpush3.bf16.msra.mxu0 %v265_v19 }
  0x41   :  { %267 = vmatprep.subr.bf16.mxu0 %v386_v0 }
  0x44   :  { %269 = vmatpush3.bf16.msra.mxu0 %v268_v22 }
  0x45   :  { %270 = vmatprep.subr.bf16.mxu0 %v386_v0 }
  0x48   :  { %272 = vmatpush3.bf16.msra.mxu0 %v271_v25 }
  0x4b   :  { %247 = vmatmul.mubr.f32.vlgmr.msra.gmra.mrb[0].mxu0 %v47_v26 }
 0x11e   :  { %v132_v28 = vpop.f32.mrb[0].mxu0 }
 0x11f   :  { %v164_v30 = vsub.f32 %v132_v28, %v64_v27  ;;  %v248_v31 = vpop.f32.mrb[1].mxu0  ;;  %v136_v32 = vmul.f32 %v132_v28, %v47_v26 }
 0x121   :  { %v138_v34 = vsel %vm137_vm1, %v136_v32, 0.0  ;;  %v165_v35 = vadd.f32 %v164_v30, %v65_v29 }
 0x122   :  { %139 = vadd.xlane.f32.xlu0 %v138_v34 }
 0x123   :  { %166 = vst [vmem:[#allocation8] sm:$0x1] %v165_v35 }
 0x126   :  { %151 = vadd.xlane.f32.xlu0 %v150_v36 }
 0x127   :  { %341 = shalt.err (!%p338_p6)
}
 0x128   :  { %s342_s26 = scalar_lea.hbm %s487_s5, 16 }
 0x129   :  { %p343_p7 = scmp.ne.s32.totalorder %s487_s5, %s342_s26  ;;  %p346_p8 = scmp.lt.u32.totalorder %s342_s26, %s487_s5 }
 0x12b   :  { %p348_p9 = pnand %p346_p8, %p343_p7 }
 0x12d   :  { %351 = shalt.err (!%p348_p9)
}
 0x12e   :  { %186 = dma.vmem_to_hbm [thread:$0]  %s184_s23, 16, %s487_s5, [#allocation9]   ;;  %vm162_vm2 = vcmask 0  }
 0x12f   :  { %s390_s10 = smov [#allocation7]  }
 0x130   :  { %s173_s5 = sshll.u32 %s390_s10, 4  ;;  %s174_s5 = int_to_ptr.vmem [resolvable:$true] %s173_s5 }
 0x131   :  { %s352_s13 = scalar_lea.vmem %s174_s5, 16  ;;  %s356_s14 = scalar_lea.vmem %s174_s5, 32 }
 0x132   :  { %p353_p10 = scmp.ne.s32.totalorder %s174_s5, %s352_s13  ;;  %p357_p11 = scmp.lt.s32.totalorder %s174_s5, %s174_s5 }
 0x133   :  { %p358_p12 = scmp.lt.s32.totalorder %s356_s14, %s352_s13 }
 0x135   :  { %p359_p13 = por %p358_p12, %p357_p11 }
 0x137   :  { %p360_p0 = pnand %p359_p13, %p353_p10 }
 0x1af   :  { %v140_v37 = vpop.xlane.xlu0 %139 }
 0x1b0   :  { %v141_v38 = vrot.slane %v140_v37, 4 }
 0x1b2   :  { %v142_v39 = vadd.f32 %v141_v38, %v140_v37 }
 0x1b3   :  { %v152_v40 = vpop.xlane.xlu0 %151 }
 0x1b4   :  { %v143_v41 = vrot.slane %v142_v39, 2  ;;  %v153_v42 = vrot.slane %v152_v40, 4 }
 0x1b6   :  { %v154_v43 = vadd.f32 %v153_v42, %v152_v40  ;;  %v144_v44 = vadd.f32 %v143_v41, %v142_v39 }
 0x1b8   :  { %v155_v45 = vrot.slane %v154_v43, 2  ;;  %v145_v46 = vrot.slane %v144_v44, 1 }
 0x1ba   :  { %v156_v47 = vadd.f32 %v155_v45, %v154_v43  ;;  %v146_v48 = vadd.f32 %v145_v46, %v144_v44 }
 0x1bc   :  { %273 = vpush %v146_v48  ;;  %v157_v49 = vrot.slane %v156_v47, 1 }
 0x1be   :  { %v158_v50 = vadd.f32 %v157_v49, %v156_v47 }
 0x1c0   :  { %275 = vpush %v158_v50 }
 0x1ed   :  { %s274_s8 = spop %273 }
 0x1ee   :  { %s148_s9 = smul.f32 0.5, %s274_s8 }
 0x1f1   :  { %s276_s11 = spop %275 }
 0x1f2   :  { %s160_s12 = ssub.f32 %s148_s9, %s276_s11 }
 0x1f4   :  { %v161_v51 = vstv %s160_s12 }
 0x1f5   :  { %163 = vst.msk [vmem:[#allocation7] sm:$0x1] %vm162_vm2, %v161_v51 }
 0x1f6   :  { %363 = shalt.err (!%p360_p0)
}
 0x1f7   :  { %s364_s16 = scalar_lea.hbm %s486_s4, 16 }
 0x1f8   :  { %p365_p1 = scmp.ne.s32.totalorder %s486_s4, %s364_s16  ;;  %p368_p2 = scmp.lt.u32.totalorder %s364_s16, %s486_s4 }
 0x1fa   :  { %p370_p3 = pnand %p368_p2, %p365_p1 }
 0x1fc   :  { %373 = shalt.err (!%p370_p3)
}
 0x1fd   :  { %176 = dma.vmem_to_hbm [thread:$0]  %s174_s5, 16, %s486_s4, [#allocation4]  }
 0x1fe   :  { %378 = dma.done.wait [#allocation4], 16  }
 0x1ff   :  { %379 = vsyncadd [#allocation4], 4294967280 }
 0x200   :  { %380 = dma.done.wait [#allocation9], 16  }
 0x201   :  { %381 = vsyncadd [#allocation9], 4294967280 }
 0x202   :  { %193 = vsyncpa [#allocation3], 1 }
 0x203   :  { %194 = vsyncpa [#allocation6], 1 }
 0x204   :  { %195 = vsyncpa [#allocation4], 1 }
 0x205   :  { %196 = vsyncpa [#allocation9], 1 }

</bundles_post_ra>
